<compile_context>
chip_gen: v7x
topology: tpu7x:2x2x1
jax: 0.10.0
libtpu: 0.0.40
codegen_flags: <defaults>
</compile_context>

<pallas_src>
import functools

import jax
import jax.numpy as jnp
from jax.experimental import pallas as pl
from jax.experimental.pallas import tpu as pltpu


def _round_up(x, k):
    return ((x + k - 1) // k) * k


def _cdiv(a, b):
    return (a + b - 1) // b


@functools.lru_cache(maxsize=1)
def _vmem_limit_bytes():
    """~75% of physical per-core VMEM (v5e/v6e: 128->96 MiB, v7x: 64->48 MiB)."""
    try:
        cap = int(pltpu.get_tpu_info().vmem_capacity_bytes)
    except Exception:
        cap = 64 << 20  # conservative (v7x-sized) fallback
    return int(min(cap * 3 // 4, 96 << 20))


def _pick_tiles(n_pad, m_pad, d_pad, csize, out_size, n_rhs):
    """Choose (tn, tm, single_buffer_rhs, vmem_limit) from the VMEM budget."""
    vmem_limit = _vmem_limit_bytes()
    work_budget = vmem_limit // 2          # leave headroom for compiler scratch

    # Prototype-side streams (reused across the whole n-tile loop): tile m when
    # the resident (tm, d_pad) blocks would not fit in ~half the working budget.
    def rhs_bytes(tm_, bufs):
        return bufs * (n_rhs * tm_ * d_pad * csize + tm_ * 4)   # + t3 (f32)

    tm = m_pad
    while tm > 128 and rhs_bytes(tm, 2) > work_budget // 2:
        tm = max(128, _round_up(tm // 2, 128))

    # Single-buffer the big prototype-side streams: their block index only
    # changes on the slow (m-tile / batch) axes, so double-buffering only helps
    # at those boundaries while doubling the largest VMEM footprint.
    single_buffer_rhs = (n_rhs * tm * d_pad * csize) > (8 << 20)
    rhs_bufs = 1 if single_buffer_rhs else 2

    # Query-side tile: as large as the remaining budget allows (amortizes the
    # ~0.35us per-grid-step overhead and keeps the pipeline busy).
    remaining = max(work_budget - rhs_bytes(tm, rhs_bufs), 1 << 20)
    per_row = 2 * d_pad * csize + 2 * tm * out_size + 2 * 4   # q, out, qn (x2 buf)
    tn_cap = max(16, (remaining // per_row) // 16 * 16)
    tn = int(min(n_pad, 1024, tn_cap))
    return tn, tm, single_buffer_rhs, vmem_limit


def _proto_head_masked_kernel(q_ref, r1_ref, r2_ref, t3_ref, o_ref):
    # q_ref : (1, tn,    D_pad)  compute_dtype (bf16 fast path)
    # r1_ref: (1, D_pad, tm)     = scale_eff * mask^2              (pre-transposed)
    # r2_ref: (1, D_pad, tm)     = -2 * scale_eff * mask^2 * p     (pre-transposed)
    # t3_ref: (1, 1,     tm)     = scale_eff * sum_d (mask*p)^2    (f32)
    # o_ref : (1, tn,    tm)
    q = q_ref[0]
    t1 = jnp.dot(q * q, r1_ref[0], preferred_element_type=jnp.float32)   # MXU
    t2 = jnp.dot(q, r2_ref[0], preferred_element_type=jnp.float32)       # MXU
    o_ref[0] = (t1 + t2 + t3_ref[0]).astype(o_ref.dtype)


def _proto_head_nomask_kernel(qn_ref, q_ref, r2_ref, t3_ref, o_ref):
    # Mask-free specialization (masktypes is int): single MXU matmul; the
    # per-query and per-prototype squared norms are precomputed in f32.
    t2 = jnp.dot(q_ref[0], r2_ref[0], preferred_element_type=jnp.float32)  # MXU
    o_ref[0] = (qn_ref[0] + t2 + t3_ref[0]).astype(o_ref.dtype)


@functools.partial(jax.jit,
                   static_argnames=("normalize", "compute_dtype", "out_dtype"))
def _proto_head_impl(scale, prototypes, masktypes, query, *, normalize,
                     compute_dtype, out_dtype):
    bs, m, dims = prototypes.shape
    n = query.shape[1]
    has_mask = masktypes is not None
    f32 = jnp.float32

    # Fold `normalize` (divide by dims) and the learned scale into one scalar
    # that is pre-multiplied into the prototype-side operands (no in-kernel
    # scalar multiply needed).
    eff = scale.astype(f32)[0]
    if normalize:
        eff = eff / f32(dims)

    d_pad = _round_up(dims, 128)     # contraction dim: lane-dense, zero padded
    m_pad = _round_up(m, 128)        # output lanes: lane-dense, zero padded
    n_pad = _round_up(n, 16)         # only to the bf16 sublane quantum

    csize = jnp.dtype(compute_dtype).itemsize
    out_size = jnp.dtype(out_dtype).itemsize
    n_rhs = 2 if has_mask else 1
    tn, tm, single_buffer_rhs, vmem_limit = _pick_tiles(
        n_pad, m_pad, d_pad, csize, out_size, n_rhs)
    n_tiles = _cdiv(n_pad, tn)
    m_tiles = _cdiv(m_pad, tm)

    # ---- jit-fused precompute: everything that depends only on prototypes /
    # mask is hoisted out of the n-tile loop and streamed once per batch. ----
    q = query.astype(f32)
    p = prototypes.astype(f32)
    q_in = jnp.pad(q.astype(compute_dtype),
                   ((0, 0), (0, n_pad - n), (0, d_pad - dims)))

    def pad_rhs(x):   # (bs, m, dims) -> K-major, padded (bs, d_pad, m_pad)
        xt = jnp.swapaxes(x.astype(compute_dtype), 1, 2)
        return jnp.pad(xt, ((0, 0), (0, d_pad - dims), (0, m_pad - m)))

    def pad_t3(x):    # (bs, m) f32 -> (bs, 1, m_pad)
        return jnp.pad(x, ((0, 0), (0, m_pad - m)))[:, None, :]

    rhs_mode = pl.Buffered(1) if single_buffer_rhs else None

    def rhs_spec():
        return pl.BlockSpec((1, d_pad, tm), lambda b, j, i: (b, 0, j),
                            pipeline_mode=rhs_mode)

    q_spec = pl.BlockSpec((1, tn, d_pad), lambda b, j, i: (b, i, 0))
    t3_spec = pl.BlockSpec((1, 1, tm), lambda b, j, i: (b, 0, j))
    out_spec = pl.BlockSpec((1, tn, tm), lambda b, j, i: (b, i, j))

    if has_mask:
        mk = masktypes.astype(f32)
        m2 = mk * mk
        r1 = pad_rhs(eff * m2)                       # scale_eff * mask^2
        r2 = pad_rhs(-2.0 * eff * m2 * p)            # -2*scale_eff*mask^2*p
        t3 = pad_t3(eff * jnp.sum(m2 * p * p, axis=-1))
        kernel = _proto_head_masked_kernel
        in_arrays = (q_in, r1, r2, t3)
        in_specs = [q_spec, rhs_spec(), rhs_spec(), t3_spec]
    else:
        r2 = pad_rhs(-2.0 * eff * p)
        t3 = pad_t3(eff * jnp.sum(p * p, axis=-1))
        # per-query squared norm kept in f32 (cancellation-sensitive term)
        qn = jnp.pad(eff * jnp.sum(q * q, axis=-1, keepdims=True),
                     ((0, 0), (0, n_pad - n), (0, 0)))
        kernel = _proto_head_nomask_kernel
        in_arrays = (qn, q_in, r2, t3)
        in_specs = [pl.BlockSpec((1, tn, 1), lambda b, j, i: (b, i, 0)),
                    q_spec, rhs_spec(), t3_spec]

    # Scheduler hints (FLOPs count only the matmuls actually emitted).
    flops = 2 * bs * n_pad * m_pad * d_pad * n_rhs
    bytes_accessed = (bs * n_pad * d_pad * csize
                      + n_rhs * bs * m_pad * d_pad * csize
                      + bs * m_pad * 4
                      + (0 if has_mask else bs * n_pad * 4)
                      + bs * n_pad * m_pad * out_size)

    out = pl.pallas_call(
        kernel,
        out_shape=jax.ShapeDtypeStruct((bs, n_pad, m_pad), out_dtype),
        grid_spec=pltpu.PrefetchScalarGridSpec(
            num_scalar_prefetch=0,
            # n-tile axis is fastest so the large prototype-side blocks are
            # reused across it without re-DMA.
            grid=(bs, m_tiles, n_tiles),
            in_specs=in_specs,
            out_specs=out_spec,
        ),
        compiler_params=pltpu.CompilerParams(
            dimension_semantics=("parallel", "parallel", "parallel"),
            vmem_limit_bytes=vmem_limit),
        cost_estimate=pl.CostEstimate(flops=flops, transcendentals=0,
                                      bytes_accessed=bytes_accessed),
    )(*in_arrays)

    return out[:, :n, :m]


def proto_head_forward(scale, prototypes, masktypes, query, support=None,
                       support_labels=None, n_way=None, n_shot=None,
                       normalize=True, compute_dtype=jnp.bfloat16,
                       out_dtype=jnp.float32):
    """Mirrors ProtoHead.forward. `support`, `support_labels`, `n_way`, `n_shot`
    are accepted (and ignored) exactly as in the PyTorch module.

    compute_dtype: MXU operand dtype (bf16 fast path; float32 for tight accuracy).
    out_dtype: logits dtype (set to bf16 to halve the output write if tolerated).
    """
    mk = None if isinstance(masktypes, int) else masktypes
    return _proto_head_impl(scale, prototypes, mk, query,
                            normalize=bool(normalize),
                            compute_dtype=jnp.dtype(compute_dtype),
                            out_dtype=jnp.dtype(out_dtype))


def proto_head_ref(scale, prototypes, masktypes, query, normalize=True):
    """Pure-JAX reference identical to the PyTorch forward."""
    bs, m, dims = prototypes.shape
    q = query[:, :, None, :]                  # (bs, n, 1, dims)
    p = prototypes[:, None, :, :]             # (bs, 1, m, dims)
    if not isinstance(masktypes, int):
        mk = masktypes[:, None, :, :]         # (bs, 1, m, dims)
        q = q * mk
        p = p * mk
    logits = jnp.sum((q - p) ** 2, axis=-1)   # (bs, n, m)
    if normalize:
        logits = logits / dims
    return scale[0] * logits


if __name__ == "__main__":
    key = jax.random.PRNGKey(0)
    k1, k2, k3, k4 = jax.random.split(key, 4)

    bs, n, m, dims = 2, 8, 4, 32
    n_way, n_shot = m, 2

    prototypes = jax.random.normal(k1, (bs, m, dims), dtype=jnp.float32)
    query = jax.random.normal(k2, (bs, n, dims), dtype=jnp.float32)
    masktypes = (jax.random.uniform(k3, (bs, m, dims)) > 0.5).astype(jnp.float32)
    support = jax.random.normal(k4, (bs, n_way * n_shot, dims), dtype=jnp.float32)
    support_labels = jnp.broadcast_to(
        jnp.tile(jnp.arange(n_way), n_shot), (bs, n_way * n_shot))

    # nn.Parameter(torch.FloatTensor([1.0])) -> deterministic init
    scale = jnp.array([1.0], dtype=jnp.float32)

    # 1) masked path, bf16 MXU operands (default fast path) -> loose tolerance
    out = jax.block_until_ready(proto_head_forward(
        scale, prototypes, masktypes, query, support, support_labels,
        n_way, n_shot, normalize=True))
    ref = proto_head_ref(scale, prototypes, masktypes, query, normalize=True)
    assert out.shape == (bs, n, m), out.shape
    assert jnp.allclose(out, ref, atol=5e-2, rtol=3e-2), "masked bf16 mismatch"

    # 2) masked path, f32 MXU operands -> tight check of the decomposition
    out32 = jax.block_until_ready(proto_head_forward(
        scale, prototypes, masktypes, query, normalize=True,
        compute_dtype=jnp.float32))
    assert jnp.allclose(out32, ref, atol=1e-4, rtol=1e-4), "masked f32 mismatch"

    # 3) masktypes is int -> specialized no-mask kernel
    out_nm = jax.block_until_ready(proto_head_forward(
        scale, prototypes, 1, query, normalize=True))
    ref_nm = proto_head_ref(scale, prototypes, 1, query, normalize=True)
    assert jnp.allclose(out_nm, ref_nm, atol=5e-2, rtol=3e-2), "no-mask mismatch"

    # 4) normalize=False path (scale-only)
    out_nn = jax.block_until_ready(proto_head_forward(
        scale, prototypes, masktypes, query, normalize=False))
    ref_nn = proto_head_ref(scale, prototypes, masktypes, query, normalize=False)
    assert jnp.allclose(out_nn, ref_nn, atol=5e-2, rtol=3e-2), "normalize=False mismatch"

    print("KERNEL_OK")
</pallas_src>

<mosaic_0001>
module attributes {stable_mosaic.version = 11 : i64} {
  func.func @_proto_head_masked_kernel(%arg0: i32, %arg1: i32, %arg2: i32, %arg3: memref<1x16x128xbf16, #tpu.memory_space<vmem>>, %arg4: memref<1x128x128xbf16, #tpu.memory_space<vmem>>, %arg5: memref<1x128x128xbf16, #tpu.memory_space<vmem>>, %arg6: memref<1x1x128xf32, #tpu.memory_space<vmem>>, %arg7: memref<1x16x128xf32, #tpu.memory_space<vmem>>) attributes {dimension_semantics = [#tpu.dimension_semantics<parallel>, #tpu.dimension_semantics<parallel>, #tpu.dimension_semantics<parallel>], iteration_bounds = array<i64: 2, 1, 1>, scalar_prefetch = 0 : i64, scratch_operands = 0 : i64, tpu.core_type = #tpu.core_type<tc>, window_params = [{transform_indices = @transform_0, window_bounds = array<i64: 1, 16, 128>}, {transform_indices = @transform_1, window_bounds = array<i64: 1, 128, 128>}, {transform_indices = @transform_2, window_bounds = array<i64: 1, 128, 128>}, {transform_indices = @transform_3, window_bounds = array<i64: 1, 1, 128>}, {transform_indices = @transform_4, window_bounds = array<i64: 1, 16, 128>}]} {
    %c0 = arith.constant 0 : index
    %c0_0 = arith.constant 0 : index
    %c0_1 = arith.constant 0 : index
    %0 = vector.load %arg3[%c0, %c0_0, %c0_1] : memref<1x16x128xbf16, #tpu.memory_space<vmem>>, vector<1x16x128xbf16>
    %1 = vector.shape_cast %0 : vector<1x16x128xbf16> to vector<16x128xbf16>
    %2 = arith.mulf %1, %1 : vector<16x128xbf16>
    %c0_2 = arith.constant 0 : index
    %c0_3 = arith.constant 0 : index
    %c0_4 = arith.constant 0 : index
    %3 = vector.load %arg4[%c0_2, %c0_3, %c0_4] : memref<1x128x128xbf16, #tpu.memory_space<vmem>>, vector<1x128x128xbf16>
    %4 = vector.shape_cast %3 : vector<1x128x128xbf16> to vector<128x128xbf16>
    %cst = arith.constant dense<0.000000e+00> : vector<16x128xf32>
    %5 = tpu.matmul %2, %4, %cst {dimension_numbers = #tpu.dot_dimension_numbers<[1], [0], [0], [1], [0, 0, 1, 1], [], []>} : vector<16x128xbf16>, vector<128x128xbf16>, vector<16x128xf32> -> vector<16x128xf32>
    %c0_5 = arith.constant 0 : index
    %c0_6 = arith.constant 0 : index
    %c0_7 = arith.constant 0 : index
    %6 = vector.load %arg5[%c0_5, %c0_6, %c0_7] : memref<1x128x128xbf16, #tpu.memory_space<vmem>>, vector<1x128x128xbf16>
    %7 = vector.shape_cast %6 : vector<1x128x128xbf16> to vector<128x128xbf16>
    %cst_8 = arith.constant dense<0.000000e+00> : vector<16x128xf32>
    %8 = tpu.matmul %1, %7, %cst_8 {dimension_numbers = #tpu.dot_dimension_numbers<[1], [0], [0], [1], [0, 0, 1, 1], [], []>} : vector<16x128xbf16>, vector<128x128xbf16>, vector<16x128xf32> -> vector<16x128xf32>
    %9 = arith.addf %5, %8 : vector<16x128xf32>
    %c0_9 = arith.constant 0 : index
    %c0_10 = arith.constant 0 : index
    %c0_11 = arith.constant 0 : index
    %10 = vector.load %arg6[%c0_9, %c0_10, %c0_11] : memref<1x1x128xf32, #tpu.memory_space<vmem>>, vector<1x1x128xf32>
    %11 = vector.shape_cast %10 : vector<1x1x128xf32> to vector<1x128xf32>
    %12 = vector.broadcast %11 : vector<1x128xf32> to vector<16x128xf32>
    %13 = arith.addf %9, %12 : vector<16x128xf32>
    %c0_12 = arith.constant 0 : index
    %c0_13 = arith.constant 0 : index
    %c0_14 = arith.constant 0 : index
    %14 = vector.load %arg7[%c0_12, %c0_13, %c0_14] : memref<1x16x128xf32, #tpu.memory_space<vmem>>, vector<1x16x128xf32>
    %15 = vector.shape_cast %14 : vector<1x16x128xf32> to vector<16x128xf32>
    %16 = vector.shape_cast %13 : vector<16x128xf32> to vector<1x16x128xf32>
    tpu.vector_store %arg7[%c0_12, %c0_13, %c0_14], %16 {strides = array<i32>} : memref<1x16x128xf32, #tpu.memory_space<vmem>>, vector<1x16x128xf32>,
    return
  }
  func.func @transform_0(%arg0: i32, %arg1: i32, %arg2: i32) -> (i32, i32, i32) {
    %c0_i32 = arith.constant 0 : i32
    %c0_i32_0 = arith.constant 0 : i32
    return %arg0, %arg2, %c0_i32 : i32, i32, i32
  }
  func.func @transform_1(%arg0: i32, %arg1: i32, %arg2: i32) -> (i32, i32, i32) {
    %c0_i32 = arith.constant 0 : i32
    %c0_i32_0 = arith.constant 0 : i32
    return %arg0, %c0_i32, %arg1 : i32, i32, i32
  }
  func.func @transform_2(%arg0: i32, %arg1: i32, %arg2: i32) -> (i32, i32, i32) {
    %c0_i32 = arith.constant 0 : i32
    %c0_i32_0 = arith.constant 0 : i32
    return %arg0, %c0_i32, %arg1 : i32, i32, i32
  }
  func.func @transform_3(%arg0: i32, %arg1: i32, %arg2: i32) -> (i32, i32, i32) {
    %c0_i32 = arith.constant 0 : i32
    %c0_i32_0 = arith.constant 0 : i32
    return %arg0, %c0_i32, %arg1 : i32, i32, i32
  }
  func.func @transform_4(%arg0: i32, %arg1: i32, %arg2: i32) -> (i32, i32, i32) {
    %c0_i32 = arith.constant 0 : i32
    return %arg0, %arg2, %arg1 : i32, i32, i32
  }
}

</mosaic_0001>

<bundles_post_ra>
// kernel: _proto_head_impl.1
= control target key start
LH: loop header
LB: loop body
LE: loop exit
PB: predicated region body
PF: predicated region fallthrough
CT: control target
= control target key end

     0   :  { %s915_s15 = smov 0   ;;  %s917_s16 = smov 0   ;;  %s983_s0 = inlined_call_operand.vmem [shape: bf16[2,16,128], index: 0, kind: input, shape index: {}]   ;;  %s984_s1 = inlined_call_operand.vmem [shape: bf16[2,128,128], index: 1, kind: input, shape index: {}]   ;;  %s985_s2 = inlined_call_operand.vmem [shape: bf16[2,128,128], index: 2, kind: input, shape index: {}]   ;;  %s986_s3 = inlined_call_operand.vmem [shape: f32[2,1,128], index: 3, kind: input, shape index: {}]   ;;  %s987_s4 = inlined_call_operand.vmem [shape: f32[2,16,128], index: 4, kind: output, shape index: {}]  }
   0x1   :  { %s919_s17 = smov 0  }
   0x2 LB: > { %s33_s18 = sadd.s32 1, %s882_s16  ;;  %p729_p0 = scmp.ge.s32.totalorder %s886_s17, 1  ;;  %s886_s17 = sphi %s919_s17, %s14_s17   ;;  %s882_s16 = sphi %s917_s16, %s989_s16   ;;  %s878_s15 = sphi %s915_s15, %s988_s15  }
   0x3   : > { %p35_p1 = scmp.ge.s32.totalorder %s33_s18, 2  ;;  %p235_p2 = scmp.lt.s32.totalorder %s886_s17, 3 }
   0x5   : > { %s991_s18 = smov (%p35_p1, %s33_s18), 0  ;;  %p236_p3 = pnand %p729_p0, %p235_p2 }
   0x6   : > { %p295_p4 = scmp.lt.s32.totalorder (!%p236_p3), %s878_s15, 1  ;;  %v888_v0 = vmov (!%p236_p3), 0.0   ;;  %vm889_vm0 = vmmov (!%p236_p3), 0  }
   0x7   : > { %239 = sbr.rel (%p236_p3) target bundleno = 269 (0x10d), region = 36  ;;  %781 = vmatprep.subr.bf16.mxu0 (!%p236_p3), %v888_v0  ;;  %801 = vmatprep.subr.bf16.mxu1 (!%p236_p3), %v888_v0 }
   0x8   : > { %797 = vmatprep.mubr.msk.bf16.mxu0 (!%p236_p3), %vm889_vm0, %v888_v0  ;;  %817 = vmatprep.mubr.msk.bf16.mxu1 (!%p236_p3), %vm889_vm0, %v888_v0 }
   0xe   : > { %s993_s15 = smov (!%p295_p4, %s878_s15), 1 }
   0xf   : > { %s760_s19 = sshll.u32 %s993_s15, 6  ;;  %s759_s26 = sshll.u32 %s993_s15, 3 }
  0x10   : > { %s939_s22 = scalar_lea.vmem %s985_s2, %s760_s19  ;;  %s944_s25 = scalar_lea.vmem %s984_s1, %s760_s19 }
  0x11   : > { %v847_v1 = vld [vmem:[%s939_s22] sm:$0xff]   ;;  %v849_v3 = vld [vmem:[%s939_s22 + $0x8] sm:$0xff]   ;;  %v851_v5 = vld [vmem:[%s939_s22 + $0x10] sm:$0xff]   ;;  %s302_s29 = scalar_lea.vmem %s983_s0, %s759_s26  ;;  %s325_s6 = scalar_lea.vmem %s986_s3, %s993_s15 }
  0x12   : > { %v848_v2 = vld [vmem:[%s944_s25] sm:$0xff]   ;;  %782 = vmatpush3.bf16.msra.mxu0 %v847_v1  ;;  %v850_v4 = vld [vmem:[%s944_s25 + $0x8] sm:$0xff]   ;;  %v852_v6 = vld [vmem:[%s944_s25 + $0x10] sm:$0xff]   ;;  %s762_s7 = sshll.u32 %s993_s15, 4 }
  0x13   : > { %802 = vmatpush3.bf16.msra.mxu1 %v848_v2  ;;  %783 = vmatprep.subr.bf16.mxu0 %v888_v0  ;;  %v853_v7 = vld [vmem:[%s939_s22 + $0x18] sm:$0xff]   ;;  %v855_v9 = vld [vmem:[%s939_s22 + $0x20] sm:$0xff]   ;;  %v857_v11 = vld [vmem:[%s939_s22 + $0x28] sm:$0xff]   ;;  %s337_s10 = scalar_lea.vmem %s987_s4, %s762_s7 }
  0x14   : > { %803 = vmatprep.subr.bf16.mxu1 %v888_v0  ;;  %v854_v8 = vld [vmem:[%s944_s25 + $0x18] sm:$0xff]   ;;  %v856_v10 = vld [vmem:[%s944_s25 + $0x20] sm:$0xff]   ;;  %v858_v12 = vld [vmem:[%s944_s25 + $0x28] sm:$0xff]  }
  0x15   : > { %v859_v13 = vld [vmem:[%s939_s22 + $0x30] sm:$0xff]   ;;  %v340_v15 = vld [vmem:[%s302_s29] sm:$0xf]  ;;  %v341_v16 = vld [vmem:[%s302_s29 + $0x4] sm:$0xf] }
  0x16   : > { %784 = vmatpush3.bf16.msra.mxu0 %v849_v3  ;;  %v860_v14 = vld [vmem:[%s944_s25 + $0x30] sm:$0xff]   ;;  %v861_v17 = vld [vmem:[%s939_s22 + $0x38] sm:$0xff]   ;;  %v342_v18 = vmul.bf16 %v340_v15, %v340_v15  ;;  %v343_v19 = vmul.bf16 %v341_v16, %v341_v16  ;;  %v738_v21 = vcombine.low %v340_v15, %v341_v16  ;;  %v756_v25 = vld [vmem:[%s325_s6] ss:$0 sm:$0xff] }
  0x17   : > { %804 = vmatpush3.bf16.msra.mxu1 %v850_v4  ;;  %785 = vmatprep.subr.bf16.mxu0 %v888_v0  ;;  %v862_v20 = vld [vmem:[%s944_s25 + $0x38] sm:$0xff]  }
  0x18   : > { %805 = vmatprep.subr.bf16.mxu1 %v888_v0  ;;  %v747_v22 = vcombine.low %v342_v18, %v343_v19 }
  0x1a   : > { %786 = vmatpush3.bf16.msra.mxu0 %v851_v5 }
  0x1b   : > { %806 = vmatpush3.bf16.msra.mxu1 %v852_v6  ;;  %787 = vmatprep.subr.bf16.mxu0 %v888_v0 }
  0x1c   : > { %807 = vmatprep.subr.bf16.mxu1 %v888_v0 }
  0x1e   : > { %788 = vmatpush3.bf16.msra.mxu0 %v853_v7 }
  0x1f   : > { %808 = vmatpush3.bf16.msra.mxu1 %v854_v8  ;;  %789 = vmatprep.subr.bf16.mxu0 %v888_v0 }
  0x20   : > { %809 = vmatprep.subr.bf16.mxu1 %v888_v0 }
  0x22   : > { %790 = vmatpush3.bf16.msra.mxu0 %v855_v9 }
  0x23   : > { %810 = vmatpush3.bf16.msra.mxu1 %v856_v10  ;;  %791 = vmatprep.subr.bf16.mxu0 %v888_v0 }
  0x24   : > { %811 = vmatprep.subr.bf16.mxu1 %v888_v0 }
  0x26   : > { %792 = vmatpush3.bf16.msra.mxu0 %v857_v11 }
  0x27   : > { %812 = vmatpush3.bf16.msra.mxu1 %v858_v12  ;;  %793 = vmatprep.subr.bf16.mxu0 %v888_v0 }
  0x28   : > { %813 = vmatprep.subr.bf16.mxu1 %v888_v0 }
  0x2a   : > { %794 = vmatpush3.bf16.msra.mxu0 %v859_v13 }
  0x2b   : > { %814 = vmatpush3.bf16.msra.mxu1 %v860_v14  ;;  %795 = vmatprep.subr.bf16.mxu0 %v888_v0 }
  0x2c   : > { %815 = vmatprep.subr.bf16.mxu1 %v888_v0 }
  0x2e   : > { %796 = vmatpush3.bf16.msra.mxu0 %v861_v17 }
  0x2f   : > { %816 = vmatpush3.bf16.msra.mxu1 %v862_v20 }
  0x31   : > { %798 = vmatmul.mubr.bf16.vlgmr.msra.gmra.mrb[0].mxu0 %v738_v21 }
  0x32   : > { %818 = vmatmul.mubr.bf16.vlgmr.msra.gmra.mrb[0].mxu1 %v747_v22 }
 0x104   : > { %v464_v23 = vpop.f32.mrb[0].mxu0 }
 0x105   : > { %v559_v24 = vpop.f32.mrb[0].mxu1  ;;  %v799_v26 = vpop.f32.mrb[1].mxu0 }
 0x106   : > { %v560_v27 = vadd.f32 %v559_v24, %v464_v23  ;;  %v819_v28 = vpop.f32.mrb[1].mxu1  ;;  %v467_v29 = vpop.f32.mrb[2].mxu0 }
 0x107   : > { %v562_v30 = vpop.f32.mrb[2].mxu1  ;;  %v800_v31 = vpop.f32.mrb[3].mxu0 }
 0x108   : > { %v573_v32 = vadd.f32 %v756_v25, %v560_v27  ;;  %v563_v33 = vadd.f32 %v562_v30, %v467_v29  ;;  %v820_v34 = vpop.f32.mrb[3].mxu1 }
 0x10a   : > { %575 = vst [vmem:[%s337_s10] sm:$0xff] %v573_v32  ;;  %v574_v35 = vadd.f32 %v756_v25, %v563_v33 }
 0x10c   : > { %576 = vst [vmem:[%s337_s10 + $0x8] sm:$0xff] %v574_v35 }
 0x10d PF: > { %s14_s17 = sadd.s32 1, %s886_s17   ;;  %s988_s15 = smov %s882_s16 }
 0x10e   : > { %p11_p5 = scmp.ge.s32.totalorder %s14_s17, 4   ;;  %s989_s16 = smov %s991_s18 }
 0x110   :  { %13 = sbr.rel (!%p11_p5) target bundleno = 2 (0x2), region = 75 }

</bundles_post_ra>
